<compile_context>
chip_gen: v7x
topology: tpu7x:2x2x1
jax: 0.10.0
libtpu: 0.0.40
codegen_flags: <defaults>
</compile_context>

<pallas_src>
import functools

import jax
import jax.numpy as jnp
from jax import lax
from jax.experimental import pallas as pl
from jax.experimental.pallas import tpu as pltpu


def _basic_block_kernel(xpad_ref, w1_ref, w2_ref, o_ref, h1pad_ref, *,
                        H, W, C8, pad_l, pad_r):
    HW = H * W
    TOT = pad_l + HW + pad_r

    # x-boundary validity masks over the flattened lane axis.  Computed once,
    # pre-broadcast to (C8, HW) so no broadcast is re-materialized per tap.
    lane = lax.broadcasted_iota(jnp.int32, (1, HW), 1)
    xcol = lane % W
    left_ok = jnp.broadcast_to((xcol >= 1).astype(jnp.float32), (C8, HW))
    right_ok = jnp.broadcast_to((xcol <= W - 2).astype(jnp.float32), (C8, HW))
    xmask = {-1: left_ok, 0: None, 1: right_ok}

    def conv3x3(src_ref, w_ref):
        # src_ref: (C8, TOT) flat image, zero-padded by >= W+1 lanes on both
        # sides.  The zero halo supplies the out-of-image rows; the x masks
        # kill the columns that wrap across a row boundary.  Returns (C8, HW).
        taps = []
        for dy in range(3):
            for dx in range(3):
                oy, ox = dy - 1, dx - 1
                off = pad_l + oy * W + ox                  # static lane offset
                win = src_ref[:, off:off + HW]             # (C8, HW)
                m = xmask[ox]
                taps.append(win if m is None else win * m)
        patch = jnp.concatenate(taps, axis=0)              # (9*C8, HW)
        # single wide-K MXU matmul per conv: (C8, 9*C8) @ (9*C8, HW)
        return jnp.dot(w_ref[...], patch, preferred_element_type=jnp.float32)

    x_view = xpad_ref.at[0]                                # (C8, TOT) ref view
    residual = x_view[:, pad_l:pad_l + HW]                 # original x, (C8, HW)

    # conv1 + ReLU: reads the host-pre-padded input directly (no scratch copy).
    h1 = jnp.maximum(conv3x3(x_view, w1_ref), 0.0)

    # conv2: reuse one small flat scratch; zero only the halo, interior is
    # fully overwritten by h1 (aligned 256-lane store at offset 128).
    h1pad_ref[:, :pad_l] = jnp.zeros((C8, pad_l), jnp.float32)
    h1pad_ref[:, pad_l + HW:TOT] = jnp.zeros((C8, pad_r), jnp.float32)
    h1pad_ref[:, pad_l:pad_l + HW] = h1
    h2 = conv3x3(h1pad_ref, w2_ref)

    # residual add (downsample=None, stride=1) + final ReLU; lane-dense store.
    o_ref[0] = jnp.maximum(h2 + residual, 0.0).astype(o_ref.dtype)


def basic_block(x, w1, w2):
    """BasicBlock forward.  x: (N, C, H, W) f32 (NCHW); w1, w2: (C, C, 3, 3) (OIHW)."""
    N, C, H, W = x.shape
    HW = H * W
    C8 = 8 * pl.cdiv(C, 8)          # channel axis padded to the f32 sublane granule
    pad_l, pad_r = 128, 128         # >= W+1; 128 keeps the interior store lane-aligned
    TOT = pad_l + HW + pad_r

    # ---------- host-side layout plumbing (cheap pads / reshapes) ----------
    x8 = jnp.pad(x, ((0, 0), (0, C8 - C), (0, 0), (0, 0)))            # (N, C8, H, W)
    x_pad = jnp.pad(x8.reshape(N, C8, HW), ((0, 0), (0, 0), (pad_l, pad_r)))

    def prep_w(w):
        # OIHW (C,C,3,3) -> (C8, 9*C8); columns ordered ((dy,dx), ci) to match
        # the in-kernel tap concatenation; padded rows/cols are zero.
        wt = jnp.transpose(w, (0, 2, 3, 1))                            # (co, dy, dx, ci)
        wp = jnp.zeros((C8, 3, 3, C8), w.dtype).at[:C, :, :, :C].set(wt)
        return wp.reshape(C8, 9 * C8)

    w1f, w2f = prep_w(w1), prep_w(w2)

    kernel = functools.partial(_basic_block_kernel, H=H, W=W, C8=C8,
                               pad_l=pad_l, pad_r=pad_r)

    flops = N * 2 * (2 * HW * 9 * C * C) + N * 3 * HW * C
    bytes_accessed = 4 * (N * C8 * TOT + N * C8 * HW + 2 * 9 * C8 * C8)

    out = pl.pallas_call(
        kernel,
        out_shape=jax.ShapeDtypeStruct((N, C8, HW), x.dtype),
        grid=(N,),                  # 2 steps -> still shards across v7x's 2 TCs
        in_specs=[
            pl.BlockSpec((1, C8, TOT), lambda n: (n, 0, 0)),
            # grid-invariant weights: whole-array VMEM residents, no per-step
            # re-fetch and no double-buffering.
            pl.BlockSpec(memory_space=pltpu.MemorySpace.VMEM),
            pl.BlockSpec(memory_space=pltpu.MemorySpace.VMEM),
        ],
        out_specs=pl.BlockSpec((1, C8, HW), lambda n: (n, 0, 0)),
        scratch_shapes=[pltpu.VMEM((C8, TOT), jnp.float32)],
        compiler_params=pltpu.CompilerParams(
            dimension_semantics=("parallel",)),
        cost_estimate=pl.CostEstimate(flops=flops, transcendentals=0,
                                      bytes_accessed=bytes_accessed),
    )(x_pad, w1f, w2f)

    return out.reshape(N, C8, H, W)[:, :C]


def reference_basic_block(x, w1, w2):
    """Pure-JAX reference: NCHW/OIHW, SAME padding, stride 1, bias=False."""
    dn = ("NCHW", "OIHW", "NCHW")
    out = lax.conv_general_dilated(x, w1, window_strides=(1, 1),
                                   padding="SAME", dimension_numbers=dn)
    out = jnp.maximum(out, 0.0)
    out = lax.conv_general_dilated(out, w2, window_strides=(1, 1),
                                   padding="SAME", dimension_numbers=dn)
    return jnp.maximum(out + x, 0.0)


if __name__ == "__main__":
    # BasicBlock(inplanes=4, planes=4, stride=1, downsample=None)
    N, C, H, W = 2, 4, 16, 16

    key = jax.random.PRNGKey(0)
    kx, kw1, kw2 = jax.random.split(key, 3)

    x = jax.random.normal(kx, (N, C, H, W), dtype=jnp.float32)
    w1 = 0.1 * jax.random.normal(kw1, (C, C, 3, 3), dtype=jnp.float32)
    w2 = 0.1 * jax.random.normal(kw2, (C, C, 3, 3), dtype=jnp.float32)

    out = jax.block_until_ready(basic_block(x, w1, w2))
    ref = jax.block_until_ready(reference_basic_block(x, w1, w2))

    assert out.shape == (N, C, H, W)
    assert jnp.allclose(out, ref, atol=1e-4, rtol=1e-4), "mismatch vs reference"

    print("KERNEL_OK")
</pallas_src>

<mosaic_0001>
module attributes {stable_mosaic.version = 11 : i64} {
  func.func @_basic_block_kernel(%arg0: i32, %arg1: memref<1x8x512xf32, #tpu.memory_space<vmem>>, %arg2: memref<8x72xf32, #tpu.memory_space<vmem>>, %arg3: memref<8x72xf32, #tpu.memory_space<vmem>>, %arg4: memref<1x8x256xf32, #tpu.memory_space<vmem>>, %arg5: memref<8x512xf32, #tpu.memory_space<vmem>>) attributes {dimension_semantics = [#tpu.dimension_semantics<parallel>], iteration_bounds = array<i64: 2>, scalar_prefetch = 0 : i64, scratch_operands = 1 : i64, tpu.core_type = #tpu.core_type<tc>, window_params = [{transform_indices = @transform_0, window_bounds = array<i64: 1, 8, 512>}, {pipeline_mode = #tpu.pipeline_mode<synchronous>, transform_indices = @transform_1, window_bounds = array<i64: 8, 72>}, {pipeline_mode = #tpu.pipeline_mode<synchronous>, transform_indices = @transform_2, window_bounds = array<i64: 8, 72>}, {transform_indices = @transform_3, window_bounds = array<i64: 1, 8, 256>}]} {
    %0 = tpu.iota {dimensions = array<i32: 1>} : vector<1x256xi32>
    %c16_i32 = arith.constant 16 : i32
    %c0_i32 = arith.constant 0 : i32
    %1 = arith.cmpi eq, %c16_i32, %c0_i32 : i32
    %c1_i32 = arith.constant 1 : i32
    %2 = arith.select %1, %c1_i32, %c16_i32 : i32
    %3 = vector.broadcast %2 : i32 to vector<1x256xi32>
    %4 = arith.remsi %0, %3 : vector<1x256xi32>
    %c0_i32_0 = arith.constant 0 : i32
    %5 = vector.broadcast %c0_i32_0 : i32 to vector<1x256xi32>
    %6 = arith.cmpi ne, %4, %5 : vector<1x256xi32>
    %c0_i32_1 = arith.constant 0 : i32
    %7 = vector.broadcast %c0_i32_1 : i32 to vector<1x256xi32>
    %8 = arith.cmpi slt, %4, %7 : vector<1x256xi32>
    %c0_i32_2 = arith.constant 0 : i32
    %9 = arith.cmpi slt, %2, %c0_i32_2 : i32
    %10 = vector.broadcast %9 : i1 to vector<1x256xi1>
    %11 = vector.broadcast %10 : vector<1x256xi1> to vector<1x256xi1>
    %12 = arith.xori %8, %11 : vector<1x256xi1>
    %13 = arith.andi %12, %6 : vector<1x256xi1>
    %14 = vector.broadcast %2 : i32 to vector<1x256xi32>
    %15 = arith.addi %4, %14 : vector<1x256xi32>
    %16 = arith.select %13, %15, %4 : vector<1x256xi1>, vector<1x256xi32>
    %c1_i32_3 = arith.constant 1 : i32
    %17 = vector.broadcast %c1_i32_3 : i32 to vector<1x256xi32>
    %18 = arith.cmpi sge, %16, %17 : vector<1x256xi32>
    %19 = arith.extui %18 : vector<1x256xi1> to vector<1x256xi32>
    %20 = arith.sitofp %19 : vector<1x256xi32> to vector<1x256xf32>
    %21 = vector.shape_cast %20 : vector<1x256xf32> to vector<1x256xf32>
    %22 = vector.broadcast %21 : vector<1x256xf32> to vector<8x256xf32>
    %c14_i32 = arith.constant 14 : i32
    %23 = vector.broadcast %c14_i32 : i32 to vector<1x256xi32>
    %24 = arith.cmpi sle, %16, %23 : vector<1x256xi32>
    %25 = arith.extui %24 : vector<1x256xi1> to vector<1x256xi32>
    %26 = arith.sitofp %25 : vector<1x256xi32> to vector<1x256xf32>
    %27 = vector.shape_cast %26 : vector<1x256xf32> to vector<1x256xf32>
    %28 = vector.broadcast %27 : vector<1x256xf32> to vector<8x256xf32>
    %c0_i32_4 = arith.constant 0 : i32
    %c0_i32_5 = arith.constant 0 : i32
    %c0_i32_6 = arith.constant 0 : i32
    %29 = tpu.memref_slice %arg1[%c0_i32_4, %c0_i32_5, %c0_i32_6] : memref<1x8x512xf32, #tpu.memory_space<vmem>> -> memref<1x8x512xf32, #tpu.memory_space<vmem>>
    %30 = tpu.memref_squeeze %29 : memref<1x8x512xf32, #tpu.memory_space<vmem>> -> memref<8x512xf32, #tpu.memory_space<vmem>>
    %c0 = arith.constant 0 : index
    %c128 = arith.constant 128 : index
    %31 = vector.load %30[%c0, %c128] : memref<8x512xf32, #tpu.memory_space<vmem>>, vector<8x256xf32>
    %c0_i32_7 = arith.constant 0 : i32
    %c0_i32_8 = arith.constant 0 : i32
    %c0_i32_9 = arith.constant 0 : i32
    %32 = tpu.memref_slice %arg1[%c0_i32_7, %c0_i32_8, %c0_i32_9] : memref<1x8x512xf32, #tpu.memory_space<vmem>> -> memref<1x8x512xf32, #tpu.memory_space<vmem>>
    %33 = tpu.memref_squeeze %32 : memref<1x8x512xf32, #tpu.memory_space<vmem>> -> memref<8x512xf32, #tpu.memory_space<vmem>>
    %c0_10 = arith.constant 0 : index
    %c111 = arith.constant 111 : index
    %34 = vector.load %33[%c0_10, %c111] : memref<8x512xf32, #tpu.memory_space<vmem>>, vector<8x256xf32>
    %35 = arith.mulf %34, %22 : vector<8x256xf32>
    %c0_i32_11 = arith.constant 0 : i32
    %c0_i32_12 = arith.constant 0 : i32
    %c0_i32_13 = arith.constant 0 : i32
    %36 = tpu.memref_slice %arg1[%c0_i32_11, %c0_i32_12, %c0_i32_13] : memref<1x8x512xf32, #tpu.memory_space<vmem>> -> memref<1x8x512xf32, #tpu.memory_space<vmem>>
    %37 = tpu.memref_squeeze %36 : memref<1x8x512xf32, #tpu.memory_space<vmem>> -> memref<8x512xf32, #tpu.memory_space<vmem>>
    %c0_14 = arith.constant 0 : index
    %c112 = arith.constant 112 : index
    %38 = vector.load %37[%c0_14, %c112] : memref<8x512xf32, #tpu.memory_space<vmem>>, vector<8x256xf32>
    %c0_i32_15 = arith.constant 0 : i32
    %c0_i32_16 = arith.constant 0 : i32
    %c0_i32_17 = arith.constant 0 : i32
    %39 = tpu.memref_slice %arg1[%c0_i32_15, %c0_i32_16, %c0_i32_17] : memref<1x8x512xf32, #tpu.memory_space<vmem>> -> memref<1x8x512xf32, #tpu.memory_space<vmem>>
    %40 = tpu.memref_squeeze %39 : memref<1x8x512xf32, #tpu.memory_space<vmem>> -> memref<8x512xf32, #tpu.memory_space<vmem>>
    %c0_18 = arith.constant 0 : index
    %c113 = arith.constant 113 : index
    %41 = vector.load %40[%c0_18, %c113] : memref<8x512xf32, #tpu.memory_space<vmem>>, vector<8x256xf32>
    %42 = arith.mulf %41, %28 : vector<8x256xf32>
    %c0_i32_19 = arith.constant 0 : i32
    %c0_i32_20 = arith.constant 0 : i32
    %c0_i32_21 = arith.constant 0 : i32
    %43 = tpu.memref_slice %arg1[%c0_i32_19, %c0_i32_20, %c0_i32_21] : memref<1x8x512xf32, #tpu.memory_space<vmem>> -> memref<1x8x512xf32, #tpu.memory_space<vmem>>
    %44 = tpu.memref_squeeze %43 : memref<1x8x512xf32, #tpu.memory_space<vmem>> -> memref<8x512xf32, #tpu.memory_space<vmem>>
    %c0_22 = arith.constant 0 : index
    %c127 = arith.constant 127 : index
    %45 = vector.load %44[%c0_22, %c127] : memref<8x512xf32, #tpu.memory_space<vmem>>, vector<8x256xf32>
    %46 = arith.mulf %45, %22 : vector<8x256xf32>
    %c0_i32_23 = arith.constant 0 : i32
    %c0_i32_24 = arith.constant 0 : i32
    %c0_i32_25 = arith.constant 0 : i32
    %47 = tpu.memref_slice %arg1[%c0_i32_23, %c0_i32_24, %c0_i32_25] : memref<1x8x512xf32, #tpu.memory_space<vmem>> -> memref<1x8x512xf32, #tpu.memory_space<vmem>>
    %48 = tpu.memref_squeeze %47 : memref<1x8x512xf32, #tpu.memory_space<vmem>> -> memref<8x512xf32, #tpu.memory_space<vmem>>
    %c0_26 = arith.constant 0 : index
    %c128_27 = arith.constant 128 : index
    %49 = vector.load %48[%c0_26, %c128_27] : memref<8x512xf32, #tpu.memory_space<vmem>>, vector<8x256xf32>
    %c0_i32_28 = arith.constant 0 : i32
    %c0_i32_29 = arith.constant 0 : i32
    %c0_i32_30 = arith.constant 0 : i32
    %50 = tpu.memref_slice %arg1[%c0_i32_28, %c0_i32_29, %c0_i32_30] : memref<1x8x512xf32, #tpu.memory_space<vmem>> -> memref<1x8x512xf32, #tpu.memory_space<vmem>>
    %51 = tpu.memref_squeeze %50 : memref<1x8x512xf32, #tpu.memory_space<vmem>> -> memref<8x512xf32, #tpu.memory_space<vmem>>
    %c0_31 = arith.constant 0 : index
    %c129 = arith.constant 129 : index
    %52 = vector.load %51[%c0_31, %c129] : memref<8x512xf32, #tpu.memory_space<vmem>>, vector<8x256xf32>
    %53 = arith.mulf %52, %28 : vector<8x256xf32>
    %c0_i32_32 = arith.constant 0 : i32
    %c0_i32_33 = arith.constant 0 : i32
    %c0_i32_34 = arith.constant 0 : i32
    %54 = tpu.memref_slice %arg1[%c0_i32_32, %c0_i32_33, %c0_i32_34] : memref<1x8x512xf32, #tpu.memory_space<vmem>> -> memref<1x8x512xf32, #tpu.memory_space<vmem>>
    %55 = tpu.memref_squeeze %54 : memref<1x8x512xf32, #tpu.memory_space<vmem>> -> memref<8x512xf32, #tpu.memory_space<vmem>>
    %c0_35 = arith.constant 0 : index
    %c143 = arith.constant 143 : index
    %56 = vector.load %55[%c0_35, %c143] : memref<8x512xf32, #tpu.memory_space<vmem>>, vector<8x256xf32>
    %57 = arith.mulf %56, %22 : vector<8x256xf32>
    %c0_i32_36 = arith.constant 0 : i32
    %c0_i32_37 = arith.constant 0 : i32
    %c0_i32_38 = arith.constant 0 : i32
    %58 = tpu.memref_slice %arg1[%c0_i32_36, %c0_i32_37, %c0_i32_38] : memref<1x8x512xf32, #tpu.memory_space<vmem>> -> memref<1x8x512xf32, #tpu.memory_space<vmem>>
    %59 = tpu.memref_squeeze %58 : memref<1x8x512xf32, #tpu.memory_space<vmem>> -> memref<8x512xf32, #tpu.memory_space<vmem>>
    %c0_39 = arith.constant 0 : index
    %c144 = arith.constant 144 : index
    %60 = vector.load %59[%c0_39, %c144] : memref<8x512xf32, #tpu.memory_space<vmem>>, vector<8x256xf32>
    %c0_i32_40 = arith.constant 0 : i32
    %c0_i32_41 = arith.constant 0 : i32
    %c0_i32_42 = arith.constant 0 : i32
    %61 = tpu.memref_slice %arg1[%c0_i32_40, %c0_i32_41, %c0_i32_42] : memref<1x8x512xf32, #tpu.memory_space<vmem>> -> memref<1x8x512xf32, #tpu.memory_space<vmem>>
    %62 = tpu.memref_squeeze %61 : memref<1x8x512xf32, #tpu.memory_space<vmem>> -> memref<8x512xf32, #tpu.memory_space<vmem>>
    %c0_43 = arith.constant 0 : index
    %c145 = arith.constant 145 : index
    %63 = vector.load %62[%c0_43, %c145] : memref<8x512xf32, #tpu.memory_space<vmem>>, vector<8x256xf32>
    %64 = arith.mulf %63, %28 : vector<8x256xf32>
    %65 = tpu.concatenate %35, %38, %42, %46, %49, %53, %57, %60, %64 in 0 : vector<8x256xf32>, vector<8x256xf32>, vector<8x256xf32>, vector<8x256xf32>, vector<8x256xf32>, vector<8x256xf32>, vector<8x256xf32>, vector<8x256xf32>, vector<8x256xf32> -> vector<72x256xf32>
    %c0_44 = arith.constant 0 : index
    %c0_45 = arith.constant 0 : index
    %66 = vector.load %arg2[%c0_44, %c0_45] : memref<8x72xf32, #tpu.memory_space<vmem>>, vector<8x72xf32>
    %cst = arith.constant dense<0.000000e+00> : vector<8x256xf32>
    %67 = tpu.matmul %66, %65, %cst {dimension_numbers = #tpu.dot_dimension_numbers<[1], [0], [0], [1], [0, 0, 1, 1], [], []>} : vector<8x72xf32>, vector<72x256xf32>, vector<8x256xf32> -> vector<8x256xf32>
    %cst_46 = arith.constant 0.000000e+00 : f32
    %68 = vector.broadcast %cst_46 : f32 to vector<8x256xf32>
    %69 = arith.maximumf %67, %68 : vector<8x256xf32>
    %cst_47 = arith.constant 0.000000e+00 : f32
    %70 = vector.broadcast %cst_47 : f32 to vector<8x128xf32>
    %c0_48 = arith.constant 0 : index
    %c0_49 = arith.constant 0 : index
    %71 = vector.load %arg5[%c0_48, %c0_49] : memref<8x512xf32, #tpu.memory_space<vmem>>, vector<8x128xf32>
    tpu.vector_store %arg5[%c0_48, %c0_49], %70 {strides = array<i32>} : memref<8x512xf32, #tpu.memory_space<vmem>>, vector<8x128xf32>,
    %cst_50 = arith.constant 0.000000e+00 : f32
    %72 = vector.broadcast %cst_50 : f32 to vector<8x128xf32>
    %c0_51 = arith.constant 0 : index
    %c384 = arith.constant 384 : index
    %73 = vector.load %arg5[%c0_51, %c384] : memref<8x512xf32, #tpu.memory_space<vmem>>, vector<8x128xf32>
    tpu.vector_store %arg5[%c0_51, %c384], %72 {strides = array<i32>} : memref<8x512xf32, #tpu.memory_space<vmem>>, vector<8x128xf32>,
    %c0_52 = arith.constant 0 : index
    %c128_53 = arith.constant 128 : index
    %74 = vector.load %arg5[%c0_52, %c128_53] : memref<8x512xf32, #tpu.memory_space<vmem>>, vector<8x256xf32>
    tpu.vector_store %arg5[%c0_52, %c128_53], %69 {strides = array<i32>} : memref<8x512xf32, #tpu.memory_space<vmem>>, vector<8x256xf32>,
    %c0_54 = arith.constant 0 : index
    %c111_55 = arith.constant 111 : index
    %75 = vector.load %arg5[%c0_54, %c111_55] : memref<8x512xf32, #tpu.memory_space<vmem>>, vector<8x256xf32>
    %76 = arith.mulf %75, %22 : vector<8x256xf32>
    %c0_56 = arith.constant 0 : index
    %c112_57 = arith.constant 112 : index
    %77 = vector.load %arg5[%c0_56, %c112_57] : memref<8x512xf32, #tpu.memory_space<vmem>>, vector<8x256xf32>
    %c0_58 = arith.constant 0 : index
    %c113_59 = arith.constant 113 : index
    %78 = vector.load %arg5[%c0_58, %c113_59] : memref<8x512xf32, #tpu.memory_space<vmem>>, vector<8x256xf32>
    %79 = arith.mulf %78, %28 : vector<8x256xf32>
    %c0_60 = arith.constant 0 : index
    %c127_61 = arith.constant 127 : index
    %80 = vector.load %arg5[%c0_60, %c127_61] : memref<8x512xf32, #tpu.memory_space<vmem>>, vector<8x256xf32>
    %81 = arith.mulf %80, %22 : vector<8x256xf32>
    %c0_62 = arith.constant 0 : index
    %c128_63 = arith.constant 128 : index
    %82 = vector.load %arg5[%c0_62, %c128_63] : memref<8x512xf32, #tpu.memory_space<vmem>>, vector<8x256xf32>
    %c0_64 = arith.constant 0 : index
    %c129_65 = arith.constant 129 : index
    %83 = vector.load %arg5[%c0_64, %c129_65] : memref<8x512xf32, #tpu.memory_space<vmem>>, vector<8x256xf32>
    %84 = arith.mulf %83, %28 : vector<8x256xf32>
    %c0_66 = arith.constant 0 : index
    %c143_67 = arith.constant 143 : index
    %85 = vector.load %arg5[%c0_66, %c143_67] : memref<8x512xf32, #tpu.memory_space<vmem>>, vector<8x256xf32>
    %86 = arith.mulf %85, %22 : vector<8x256xf32>
    %c0_68 = arith.constant 0 : index
    %c144_69 = arith.constant 144 : index
    %87 = vector.load %arg5[%c0_68, %c144_69] : memref<8x512xf32, #tpu.memory_space<vmem>>, vector<8x256xf32>
    %c0_70 = arith.constant 0 : index
    %c145_71 = arith.constant 145 : index
    %88 = vector.load %arg5[%c0_70, %c145_71] : memref<8x512xf32, #tpu.memory_space<vmem>>, vector<8x256xf32>
    %89 = arith.mulf %88, %28 : vector<8x256xf32>
    %90 = tpu.concatenate %76, %77, %79, %81, %82, %84, %86, %87, %89 in 0 : vector<8x256xf32>, vector<8x256xf32>, vector<8x256xf32>, vector<8x256xf32>, vector<8x256xf32>, vector<8x256xf32>, vector<8x256xf32>, vector<8x256xf32>, vector<8x256xf32> -> vector<72x256xf32>
    %c0_72 = arith.constant 0 : index
    %c0_73 = arith.constant 0 : index
    %91 = vector.load %arg3[%c0_72, %c0_73] : memref<8x72xf32, #tpu.memory_space<vmem>>, vector<8x72xf32>
    %cst_74 = arith.constant dense<0.000000e+00> : vector<8x256xf32>
    %92 = tpu.matmul %91, %90, %cst_74 {dimension_numbers = #tpu.dot_dimension_numbers<[1], [0], [0], [1], [0, 0, 1, 1], [], []>} : vector<8x72xf32>, vector<72x256xf32>, vector<8x256xf32> -> vector<8x256xf32>
    %93 = arith.addf %92, %31 : vector<8x256xf32>
    %cst_75 = arith.constant 0.000000e+00 : f32
    %94 = vector.broadcast %cst_75 : f32 to vector<8x256xf32>
    %95 = arith.maximumf %93, %94 : vector<8x256xf32>
    %c0_76 = arith.constant 0 : index
    %c0_77 = arith.constant 0 : index
    %c0_78 = arith.constant 0 : index
    %96 = vector.load %arg4[%c0_76, %c0_77, %c0_78] : memref<1x8x256xf32, #tpu.memory_space<vmem>>, vector<1x8x256xf32>
    %97 = vector.shape_cast %96 : vector<1x8x256xf32> to vector<8x256xf32>
    %98 = vector.shape_cast %95 : vector<8x256xf32> to vector<1x8x256xf32>
    tpu.vector_store %arg4[%c0_76, %c0_77, %c0_78], %98 {strides = array<i32>} : memref<1x8x256xf32, #tpu.memory_space<vmem>>, vector<1x8x256xf32>,
    return
  }
  func.func @transform_0(%arg0: i32) -> (i32, i32, i32) {
    %c0_i32 = arith.constant 0 : i32
    %c0_i32_0 = arith.constant 0 : i32
    %c0_i32_1 = arith.constant 0 : i32
    return %arg0, %c0_i32, %c0_i32_0 : i32, i32, i32
  }
  func.func @transform_1(%arg0: i32) -> (i32, i32) {
    %c0_i32 = arith.constant 0 : i32
    %c0_i32_0 = arith.constant 0 : i32
    %c0_i32_1 = arith.constant 0 : i32
    return %c0_i32, %c0_i32_0 : i32, i32
  }
  func.func @transform_2(%arg0: i32) -> (i32, i32) {
    %c0_i32 = arith.constant 0 : i32
    %c0_i32_0 = arith.constant 0 : i32
    %c0_i32_1 = arith.constant 0 : i32
    return %c0_i32, %c0_i32_0 : i32, i32
  }
  func.func @transform_3(%arg0: i32) -> (i32, i32, i32) {
    %c0_i32 = arith.constant 0 : i32
    %c0_i32_0 = arith.constant 0 : i32
    %c0_i32_1 = arith.constant 0 : i32
    return %arg0, %c0_i32, %c0_i32_0 : i32, i32, i32
  }
}

</mosaic_0001>

<bundles_post_ra>
// kernel: tpu_custom_call.1
= control target key start
LH: loop header
LB: loop body
LE: loop exit
PB: predicated region body
PF: predicated region fallthrough
CT: control target
= control target key end

     0   :  { %8 = vsyncpa [#allocation4], 0  ;;  %s2027_s0 = inlined_call_operand.hbm [shape: f32[2,8,512], index: 0, kind: input, shape index: {}]   ;;  %s2028_s1 = inlined_call_operand.hbm [shape: f32[8,72], index: 1, kind: input, shape index: {}]   ;;  %s2029_s2 = inlined_call_operand.hbm [shape: f32[8,72], index: 2, kind: input, shape index: {}]   ;;  %s2030_s3 = inlined_call_operand.hbm [shape: f32[2,8,256], index: 3, kind: output, shape index: {}]  }
   0x1   :  { %10 = vsyncpa [#allocation4 + $0x1], 0 }
   0x2   :  { %11 = vsyncpa [#allocation7], 0 }
   0x3   :  { %12 = vsyncpa [#allocation5], 0 }
   0x4   :  { %14 = vsyncpa [#allocation5 + $0x1], 0  ;;  %s1531_s12 = smov 0   ;;  %s1533_s13 = smov 0  }
   0x5   :  { %s1535_s14 = smov 0   ;;  %s1537_s15 = smov 0  }
   0x6 LB: > { %s1552_s16 = sadd.s32 4294967295, %s1492_s15   ;;  %s978_s17 = sadd.s32 4294967294, %s1492_s15   ;;  %s1492_s15 = sphi %s1537_s15, %s2050_s15   ;;  %s1488_s14 = sphi %s1535_s14, %s2049_s14   ;;  %s1484_s13 = sphi %s1533_s13, %s2048_s13   ;;  %s1480_s12 = sphi %s1531_s12, %s2047_s12  }
   0x7   : > { %p40_p0 = scmp.ne.s32.totalorder %s1484_s13, %s1480_s12  ;;  %p2031_p1 = scmp.eq.s32.totalorder %s1552_s16, 0 }
   0x8   : > { %p112_p3 = scmp.eq.s32.totalorder %s978_s17, 1  ;;  %p979_p5 = scmp.ge.s32.totalorder %s1492_s15, 1 }
   0x9   : > { %p1561_p4 = por %p2031_p1, %p40_p0  ;;  %p119_p7 = scmp.lt.s32.totalorder %s1492_s15, 3 }
   0xa   : > { %p1566_p6 = por %p112_p3, %p40_p0  ;;  %s1494_s21 = smov [#allocation6]  }
   0xb   : > { %s2034_s18 = scalar_select %p1561_p4, 1, 0 }
   0xc   : > { %s2035_s19 = scalar_select %p1566_p6, 1, 0 }
   0xd   : > { %p1571_p8 = pnand %p979_p5, %p119_p7  ;;  %s132_s22 = sshll.u32 %s1494_s21, 4  ;;  %s133_s22 = int_to_ptr.vmem [resolvable:$true] %s132_s22 }
   0xe   : > { %s1495_s23 = smov [#allocation8]   ;;  %s1587_s26 = sadd.s32 1, %s1492_s15  }
   0xf   : > { %s2036_s20 = scalar_select %p1571_p8, 1, 0 }
  0x10   : > { %p1048_p10 = pneg %p1571_p8  ;;  %s143_s24 = sshll.u32 %s1495_s23, 4  ;;  %s1584_s24 = int_to_ptr.vmem [resolvable:$true] %s143_s24 }
  0x11   : > { %s24_s27 = ssub.s32 %s1492_s15, %s1587_s26  ;;  %s1336_s30 = scalar_lea.hbm %s2028_s1, 128 }
  0x12   : > { %p1580_p11 = pnand %p1048_p10, %p2031_p1  ;;  %p1337_p12 = scmp.ne.s32.totalorder %s2028_s1, %s1336_s30 }
  0x13   : > { %p1343_p5 = scmp.lt.u32.totalorder %s1336_s30, %s2028_s1 }
  0x14   : > { %p1338_p13 = pneg %p1580_p11 }
  0x16   : > { %p1339_p0 = pnand %p1338_p13, %p1337_p12 }
  0x18   : > { %p1340_p3 = pneg %p1339_p0 }
  0x1a   : > { %p1345_p7 = pnand %p1343_p5, %p1340_p3 }
  0x1c   : > { %1348 = shalt.err (!%p1345_p7)
}
  0x1d   : > { %s1349_s8 = scalar_lea.vmem %s133_s22, 128  ;;  %p1357_p2 = scmp.lt.s32.totalorder %s133_s22, %s133_s22 }
  0x1e   : > { %p1350_p10 = scmp.ne.s32.totalorder %s133_s22, %s1349_s8  ;;  %p1358_p6 = scmp.lt.s32.totalorder %s1349_s8, %s1349_s8 }
  0x20   : > { %p1352_p9 = pnand %p1350_p10, %p1338_p13  ;;  %p1359_p4 = por %p1358_p6, %p1357_p2 }
  0x22   : > { %p1353_p1 = pneg %p1352_p9 }
  0x24   : > { %p1360_p8 = pnand %p1359_p4, %p1353_p1 }
  0x26   : > { %1363 = shalt.err (!%p1360_p8)
}
  0x27   : > { %1051 = dma.hbm_to_vmem [thread:$0]  (!%p1580_p11), %s2028_s1, 128, %s133_s22, [#allocation7]  }
  0x28   : > { %s1364_s21 = scalar_lea.hbm %s2029_s2, 128 }
  0x29   : > { %p1365_p9 = scmp.ne.s32.totalorder %s2029_s2, %s1364_s21  ;;  %p1371_p4 = scmp.lt.u32.totalorder %s1364_s21, %s2029_s2 }
  0x2b   : > { %p1367_p2 = pnand %p1365_p9, %p1338_p13 }
  0x2d   : > { %p1368_p1 = pneg %p1367_p2 }
  0x2f   : > { %p1373_p6 = pnand %p1371_p4, %p1368_p1 }
  0x31   : > { %1376 = shalt.err (!%p1373_p6)
}
  0x32   : > { %s1377_s22 = scalar_lea.vmem %s1584_s24, 128  ;;  %p1385_p3 = scmp.lt.s32.totalorder %s1584_s24, %s1584_s24 }
  0x33   : > { %p1378_p8 = scmp.ne.s32.totalorder %s1584_s24, %s1377_s22  ;;  %p1386_p5 = scmp.lt.s32.totalorder %s1377_s22, %s1377_s22 }
  0x35   : > { %p1380_p12 = pnand %p1378_p8, %p1338_p13  ;;  %p1387_p7 = por %p1386_p5, %p1385_p3 }
  0x37   : > { %p1381_p0 = pneg %p1380_p12 }
  0x39   : > { %p1388_p10 = pnand %p1387_p7, %p1381_p0 }
  0x3b   : > { %1391 = shalt.err (!%p1388_p10)
}
  0x3c   : > { %1054 = dma.hbm_to_vmem [thread:$0]  (!%p1580_p11), %s2029_s2, 128, %s1584_s24, [#allocation7]  }
  0x3d   : > { %p25_p13 = scmp.eq.s32.totalorder %s24_s27, 0  ;;  %s27_s6 = sadd.s32 1, %s1488_s14 }
  0x3e   : > { %p34_p9 = scmp.ne.s32.totalorder %s1488_s14, %s1484_s13  ;;  %p35_p2 = scmp.eq.s32.totalorder %s1492_s15, 0 }
  0x3f   : > { %s1646_s25 = scalar_select %p25_p13, %s1488_s14, %s27_s6  }
  0x40   : > { %p36_p1 = por %p35_p2, %p34_p9  ;;  %p2038_p4 = scmp.eq.s32.totalorder %s1552_s16, 1 }
  0x41   : > { %p1065_p8 = scmp.lt.s32.totalorder %s1492_s15, 2  ;;  %s154_s8 = sand.u32 1, %s1488_s14  }
  0x42   : > { %p1650_p6 = por %p2038_p4, %p34_p9  ;;  %s983_s9 = sshll.u32 %s154_s8, 5 }
  0x43   : > { %s1002_s10 = sshll.u32 %s1492_s15, 9  ;;  %s158_s27 = scalar_lea.vmem [#allocation3], %s983_s9 }
  0x44   : > { %s1660_s24 = scalar_lea.hbm %s2027_s0, %s1002_s10  ;;  %s166_s21 = sshll.u32 %s158_s27, 4  ;;  %s1662_s21 = int_to_ptr.vmem [resolvable:$true] %s166_s21 }
  0x45   : > { %p1664_p11 = pnand %p1065_p8, %p36_p1  ;;  %s155_s28 = scalar_lea.sflag [#allocation4], %s154_s8 }
  0x46   : > { %s1392_s29 = scalar_lea.hbm %s1660_s24, 512  ;;  %s1397_s4 = scalar_lea.hbm %s2027_s0, 1024 }
  0x47   : > { %p1393_p12 = scmp.ne.s32.totalorder %s1660_s24, %s1392_s29  ;;  %p1394_p0 = pneg %p1664_p11 }
  0x48   : > { %p1398_p7 = scmp.lt.u32.totalorder %s1660_s24, %s2027_s0  ;;  %p1399_p10 = scmp.lt.u32.totalorder %s1397_s4, %s1392_s29 }
  0x49   : > { %p1395_p3 = pnand %p1394_p0, %p1393_p12  ;;  %p1401_p9 = scmp.lt.u32.totalorder %s1392_s29, %s1660_s24 }
  0x4a   : > { %p1400_p13 = por %p1399_p10, %p1398_p7 }
  0x4b   : > { %p1396_p5 = pneg %p1395_p3 }
  0x4c   : > { %p1402_p2 = por %p1401_p9, %p1400_p13 }
  0x4e   : > { %p1403_p1 = pnand %p1402_p2, %p1396_p5 }
  0x50   : > { %1406 = shalt.err (!%p1403_p1)
}
  0x51   : > { %s1407_s8 = scalar_lea.vmem %s1662_s21, 512  ;;  %s1496_s9 = smov [#allocation3]  }
  0x52   : > { %p1408_p4 = scmp.ne.s32.totalorder %s1662_s21, %s1407_s8  ;;  %s1412_s10 = sshll.u32 %s1496_s9, 4  ;;  %s1413_s10 = int_to_ptr.vmem [resolvable:$false] %s1412_s10 }
  0x53   : > { %s1414_s11 = scalar_lea.vmem %s1413_s10, 1024  ;;  %p1415_p3 = scmp.lt.s32.totalorder %s1662_s21, %s1413_s10 }
  0x54   : > { %p1410_p8 = pnand %p1408_p4, %p1394_p0  ;;  %p1416_p7 = scmp.lt.s32.totalorder %s1414_s11, %s1407_s8 }
  0x56   : > { %p1411_p12 = pneg %p1410_p8  ;;  %p1417_p10 = por %p1416_p7, %p1415_p3 }
  0x58   : > { %p1418_p13 = pnand %p1417_p10, %p1411_p12 }
  0x5a   : > { %1421 = shalt.err (!%p1418_p13)
}
  0x5b   : > { %1058 = dma.hbm_to_vmem [thread:$0]  (!%p1664_p11), %s1660_s24, 512, %s1662_s21, %s155_s28  }
  0x5c   : > { %p2041_p5 = scmp.ne.s32.totalorder %s2036_s20, 0 }
  0x5d   : > { %s1696_s17 = sand.u32 (!%p2041_p5), 1, %s1484_s13   ;;  %p2042_p0 = scmp.ne.s32.totalorder (!%p2041_p5), %s2034_s18, 0 }
  0x5e   : > { %175 = sbr.rel (%p2041_p5) target bundleno = 1222 (0x4c6), region = 32  ;;  %s987_s27 = sshll.u32 (!%p2041_p5), %s1696_s17, 5 }
  0x5f   : > { %s178_s29 = scalar_lea.sflag (!%p2041_p5), [#allocation4], %s1696_s17  ;;  %s1700_s30 = scalar_lea.vmem (!%p2041_p5), [#allocation3], %s987_s27 }
  0x65   : > { %1467 = dma.done.wait (%p2042_p0), %s178_s29, 512  }
  0x66   : > { %1469 = vsyncadd (%p2042_p0), %s178_s29, 4294966784  ;;  %p2043_p11 = scmp.eq.s32.totalorder %s1552_s16, 0 }
  0x68   : > { %1471 = dma.done.wait (%p2043_p11), [#allocation7], 256   ;;  %p2044_p9 = pmov %p2043_p11 }
  0x69   : > { %v212_v0 = vlaneseq  ;;  %v1497_v1 = vmov 0.0   ;;  %s1498_s18 = smov 113   ;;  %s1499_s20 = smov 1   ;;  %v1718_v12 = vld [vmem:[%s1700_s30 + $0x8] sm:$0xff]  ;;  %v1721_v13 = vld [vmem:[%s1700_s30 + $0x10] sm:$0xff]  ;;  %v1728_v15 = vld [vmem:[%s1700_s30] sm:$0xff] }
  0x6a   : > { %1473 = vsyncadd (%p2044_p9), [#allocation7], 4294967040  ;;  %583 = vmatprep.mubr.f32.mxu0 %v1497_v1  ;;  %863 = vmatprep.mubr.f32.mxu1 %v1497_v1  ;;  %s1500_s24 = smov 127   ;;  %s1501_s21 = smov 15   ;;  %v1141_v14 = vpack.i.bf16 %v1721_v13, %v1718_v12  ;;  %vm274_vm4 = vcmask 924672   ;;  %v1741_v21 = vld [vmem:[%s1700_s30 + $0x18] sm:$0xff] }
  0x6b   : > { %v213_v2 = vand.u32 127, %v212_v0  ;;  %s1502_s23 = smov 17   ;;  %s1503_s28 = smov 111   ;;  %vm286_vm5 = vcmask 1039360   ;;  %vm301_vm6 = vcmask 7168   ;;  %vm313_vm7 = vcmask 121856  }
  0x6c   : > { %s1504_s22 = smov 126   ;;  %s1505_s4 = smov 112   ;;  %vm325_vm8 = vcmask 138240   ;;  %vm260_vm9 = vcmask 908288   ;;  %vm353_vm10 = vcmask 1031168   ;;  %vm365_vm11 = vcmask 916480  }
  0x6d   : > { %v214_v3 = vadd.s32 128, %v213_v2  ;;  %v219_v4 = vand.u32 15, %v213_v2  ;;  %s1506_s5 = smov 110   ;;  %s1507_s6 = smov 95   ;;  %vm382_vm12 = vcmask 900096   ;;  %vm406_vm13 = vcmask 777216  }
  0x6e   : > { %s1508_s8 = smov 96   ;;  %s1509_s9 = smov 94   ;;  %vm394_vm14 = vcmask 785408   ;;  %vm418_vm15 = vcmask 769024  }
  0x6f   : > { %v226_v5 = vand.u32 15, %v214_v3  ;;  %vm245_vm0 = vcmp.le.s32.totalorder %v219_v4, 14  ;;  %vm239_vm1 = vcmp.ge.s32.totalorder %v219_v4, 1  ;;  %s990_s10 = sshll.u32 %s1696_s17, 4  ;;  %s1003_s11 = sshll.u32 %s1552_s16, 8 }
  0x70   : > { %v993_v6 = vsel %vm245_vm0, 1.0, %v1497_v1  ;;  %v991_v8 = vsel %vm239_vm1, 1.0, %v1497_v1  ;;  %vm515_vm0 = vcmask 588800   ;;  %s211_s27 = scalar_lea.vmem [#allocation9], %s990_s10 }
  0x71   : > { %vm246_vm2 = vcmp.le.s32.totalorder %v226_v5, 14  ;;  %vm240_vm3 = vcmp.ge.s32.totalorder %v226_v5, 1  ;;  %s889_s29 = sshll.u32 %s211_s27, 4  ;;  %s1985_s29 = int_to_ptr.vmem [resolvable:$true] %s889_s29 }
  0x72   : > { %v994_v7 = vsel %vm246_vm2, 1.0, %v1497_v1  ;;  %v992_v9 = vsel %vm240_vm3, 1.0, %v1497_v1  ;;  %s1422_s16 = scalar_lea.vmem %s1985_s29, 256 }
  0x73   : > { %v1116_v10 = vpack.i.bf16 %v994_v7, %v993_v6  ;;  %v1121_v11 = vpack.i.bf16 %v992_v9, %v991_v8  ;;  %p1423_p2 = scmp.ne.s32.totalorder %s1985_s29, %s1422_s16 }
  0x75   : > { %1117 = vrot.lane.b32.xlu0 %v1116_v10, %s1498_s18  ;;  %1127 = vrot.lane.b32.xlu1 %v1116_v10, %s1499_s20  ;;  %s1983_s20 = scalar_lea.hbm %s2030_s3, %s1003_s11  ;;  %p1424_p1 = pnand %p1423_p2, %p1650_p6 }
  0x77   : > { %p1425_p4 = pneg %p1424_p1 }
  0x79   : > { %1122 = vrot.lane.b32.xlu0 %v1121_v11, %s1500_s24  ;;  %1132 = vrot.lane.b32.xlu1 %v1121_v11, %s1501_s21  ;;  %s1510_s21 = smov [#allocation9]  }
  0x7d   : > { %1137 = vrot.lane.b32.xlu0 %v1116_v10, %s1502_s23  ;;  %1147 = vrot.lane.b32.xlu1 %v1121_v11, %s1503_s28 }
  0x81   : > { %1142 = vrot.lane.b32.xlu0 %v1141_v14, %s1500_s24  ;;  %336 = vrot.lane.b32.xlu1 %v1728_v15, %s1500_s24 }
  0x85   : > { %1152 = vrot.lane.b32.xlu0 %v1141_v14, %s1503_s28 }
  0xe7   : > { %v1118_v16 = vpop.permute.xlu0 %1117  ;;  %v1128_v17 = vpop.permute.xlu1 %1127 }
  0xe8   : > { %v1734_v18 = vunpack.i.h.bf16 %v1118_v16  ;;  %v1736_v19 = vunpack.i.l.bf16 %v1118_v16  ;;  %v1738_v20 = vunpack.i.h.bf16 %v1128_v17  ;;  %v1762_v32 = vunpack.i.l.bf16 %v1128_v17 }
  0xea   : > { %v279_v22 = vmul.f32 %v1736_v19, %v1728_v15  ;;  %v1747_v23 = vsel %vm274_vm4, %v1736_v19, %v1734_v18  ;;  %v308_v27 = vmul.f32 %v1738_v20, %v1741_v21  ;;  %v281_v31 = vmul.f32 %v1734_v18, %v1721_v13 }
  0xeb   : > { %v1123_v24 = vpop.permute.xlu0 %1122  ;;  %v1133_v28 = vpop.permute.xlu1 %1132  ;;  %v280_v30 = vmul.f32 %v1747_v23, %v1718_v12  ;;  %v1781_v40 = vsel %vm301_vm6, %v1762_v32, %v1738_v20  ;;  %v306_v48 = vmul.f32 %v1762_v32, %v1718_v12 }
  0xec   : > { %v1749_v25 = vunpack.i.h.bf16 %v1123_v24  ;;  %v1751_v26 = vunpack.i.l.bf16 %v1123_v24  ;;  %347 = vrot.lane.b32.xlu0 %v279_v22, %s1504_s22  ;;  %v1771_v34 = vunpack.i.h.bf16 %v1133_v28  ;;  %v1773_v36 = vunpack.i.l.bf16 %v1133_v28 }
  0xed   : > { %v1156_v37 = vpack.i.bf16 %v281_v31, %v280_v30  ;;  %v307_v49 = vmul.f32 %v1781_v40, %v1721_v13 }
  0xee   : > { %v291_v29 = vmul.f32 %v1751_v26, %v1728_v15  ;;  %v1767_v33 = vsel %vm286_vm5, %v1751_v26, %v1749_v25  ;;  %v293_v39 = vmul.f32 %v1749_v25, %v1721_v13  ;;  %v320_v41 = vmul.f32 %v1771_v34, %v1741_v21 }
  0xef   : > { %v1138_v35 = vpop.permute.xlu0 %1137  ;;  %v292_v38 = vmul.f32 %v1767_v33, %v1718_v12  ;;  %v1148_v42 = vpop.permute.xlu1 %1147  ;;  %v1789_v44 = vsel %vm313_vm7, %v1773_v36, %v1771_v34  ;;  %v318_v50 = vmul.f32 %v1773_v36, %v1718_v12  ;;  %v1171_v55 = vpack.i.bf16 %v307_v49, %v306_v48 }
  0xf0   : > { %359 = vrot.lane.b32.xlu1 %v291_v29, %s1505_s4  ;;  %380 = vrot.lane.b32.xlu0 %v308_v27, %s1506_s5  ;;  %v1791_v45 = vunpack.i.h.bf16 %v1138_v35  ;;  %v1793_v46 = vunpack.i.l.bf16 %v1138_v35  ;;  %v319_v51 = vmul.f32 %v1789_v44, %v1721_v13  ;;  %v1805_v52 = vunpack.i.l.bf16 %v1148_v42 }
  0xf1   : > { %v1166_v47 = vpack.i.bf16 %v293_v39, %v292_v38  ;;  %v1821_v61 = vunpack.i.h.bf16 %v1148_v42 }
  0xf2   : > { %v1810_v53 = vsel %vm325_vm8, %v1793_v46, %v1791_v45  ;;  %v1176_v58 = vpack.i.bf16 %v319_v51, %v318_v50  ;;  %v265_v60 = vmul.f32 %v1805_v52, %v1728_v15  ;;  %v330_v2 = vmul.f32 %v1793_v46, %v1718_v12 }
  0xf3   : > { %v1143_v43 = vpop.permute.xlu0 %1142  ;;  %v337_v56 = vpop.permute.xlu1 %336  ;;  %v331_v59 = vmul.f32 %v1810_v53, %v1721_v13  ;;  %v1833_v4 = vsel %vm260_vm9, %v1805_v52, %v1821_v61  ;;  %v332_v7 = vmul.f32 %v1791_v45, %v1741_v21  ;;  %v267_v10 = vmul.f32 %v1821_v61, %v1721_v13 }
  0xf4   : > { %1162 = vrot.lane.b32.xlu1 %v1141_v14, %s1507_s6  ;;  %1157 = vrot.lane.b32.xlu0 %v1156_v37, %s1504_s22  ;;  %v1144_v54 = vunpack.i.l.bf16 %v1143_v43  ;;  %v1145_v5 = vunpack.i.h.bf16 %v1143_v43  ;;  %v266_v9 = vmul.f32 %v1833_v4, %v1718_v12 }
  0xf6   : > { %v342_v62 = vsel %vm286_vm5, %v337_v56, %v1144_v54  ;;  %v343_v11 = vsel %vm286_vm5, %v1144_v54, %v1145_v5  ;;  %v1196_v15 = vpack.i.bf16 %v267_v10, %v266_v9 }
  0xf7   : > { %v1812_v57 = vpop.permute.xlu0 %1152  ;;  %v1186_v3 = vpack.i.bf16 %v342_v62, %v265_v60  ;;  %v1181_v14 = vpack.i.bf16 %v1145_v5, %v343_v11 }
  0xf8   : > { %1167 = vrot.lane.b32.xlu1 %v1166_v47, %s1505_s4  ;;  %392 = vrot.lane.b32.xlu0 %v320_v41, %s1508_s8  ;;  %v1155_v63 = vunpack.i.h.bf16 %v1812_v57  ;;  %v1154_v0 = vunpack.i.l.bf16 %v1812_v57 }
  0xfa   : > { %v372_v6 = vsel %vm260_vm9, %v1154_v0, %v1155_v63 }
  0xfb   : > { %v1191_v8 = vpack.i.bf16 %v1155_v63, %v372_v6 }
  0xfc   : > { %1172 = vrot.lane.b32.xlu1 %v1171_v55, %s1506_s5  ;;  %404 = vrot.lane.b32.xlu0 %v1741_v21, %s1507_s6 }
 0x100   : > { %1177 = vrot.lane.b32.xlu1 %v1176_v58, %s1508_s8  ;;  %414 = vrot.lane.b32.xlu0 %v331_v59, %s1509_s9 }
 0x104   : > { %412 = vrot.lane.b32.xlu1 %v330_v2, %s1509_s9  ;;  %1187 = vrot.lane.b32.xlu0 %v1186_v3, %s1502_s23 }
 0x108   : > { %416 = vrot.lane.b32.xlu1 %v332_v7, %s1509_s9  ;;  %1192 = vrot.lane.b32.xlu0 %v1191_v8, %s1502_s23 }
 0x10c   : > { %1182 = vrot.lane.b32.xlu1 %v1181_v14, %s1502_s23  ;;  %1197 = vrot.lane.b32.xlu0 %v1196_v15, %s1502_s23 }
 0x15e   : > { %v348_v16 = vpop.permute.xlu0 %347 }
 0x162   : > { %v360_v17 = vpop.permute.xlu1 %359  ;;  %v381_v21 = vpop.permute.xlu0 %380 }
 0x166   : > { %v1163_v22 = vpop.permute.xlu1 %1162  ;;  %v1158_v24 = vpop.permute.xlu0 %1157 }
 0x167   : > { %v1160_v27 = vunpack.i.h.bf16 %v1158_v24  ;;  %v1159_v28 = vunpack.i.l.bf16 %v1158_v24  ;;  %v1165_v54 = vunpack.i.h.bf16 %v1163_v22  ;;  %v1164_v55 = vunpack.i.l.bf16 %v1163_v22 }
 0x169   : > { %v355_v29 = vsel %vm353_vm10, %v1159_v28, %v1160_v27  ;;  %v354_v41 = vsel %vm353_vm10, %v348_v16, %v1159_v28  ;;  %v407_v5 = vsel %vm406_vm13, %v1164_v55, %v1165_v54 }
 0x16a   : > { %v1201_v30 = vpack.i.bf16 %v1160_v27, %v355_v29  ;;  %v1168_v31 = vpop.permute.xlu1 %1167  ;;  %v393_v35 = vpop.permute.xlu0 %392 }
 0x16b   : > { %v1170_v37 = vunpack.i.h.bf16 %v1168_v31  ;;  %v1169_v38 = vunpack.i.l.bf16 %v1168_v31 }
 0x16c   : > { %1202 = vrot.lane.b32.xlu1 %v1201_v30, %s1502_s23 }
 0x16d   : > { %v367_v39 = vsel %vm365_vm11, %v1169_v38, %v1170_v37  ;;  %v366_v42 = vsel %vm365_vm11, %v360_v17, %v1169_v38 }
 0x16e   : > { %v1206_v43 = vpack.i.bf16 %v1170_v37, %v367_v39  ;;  %v1173_v47 = vpop.permute.xlu1 %1172  ;;  %v405_v48 = vpop.permute.xlu0 %404  ;;  %v1221_v49 = vpack.i.bf16 %v366_v42, %v354_v41  ;;  %v602_v41 = vmul.f32 0.0, %v1736_v19 }
 0x16f   : > { %v1175_v50 = vunpack.i.h.bf16 %v1173_v47  ;;  %v1174_v51 = vunpack.i.l.bf16 %v1173_v47  ;;  %v408_v63 = vsel %vm406_vm13, %v1165_v54, %v405_v48  ;;  %v613_v47 = vmul.f32 0.0, %v1738_v20 }
 0x170   : > { %1222 = vrot.lane.b32.xlu1 %v1221_v49, %s1502_s23  ;;  %1207 = vrot.lane.b32.xlu0 %v1206_v43, %s1502_s23  ;;  %v1216_v7 = vpack.i.bf16 %v408_v63, %v407_v5  ;;  %v605_v48 = vmul.f32 0.0, %v1751_v26 }
 0x171   : > { %v1211_v56 = vpack.i.bf16 %v1174_v51, %v1154_v0  ;;  %v383_v57 = vsel %vm382_vm12, %v1174_v51, %v1175_v50  ;;  %v384_v58 = vsel %vm382_vm12, %v1175_v50, %v381_v21 }
 0x172   : > { %v1178_v59 = vpop.permute.xlu1 %1177  ;;  %v1226_v60 = vpack.i.bf16 %v384_v58, %v383_v57  ;;  %v415_v62 = vpop.permute.xlu0 %414 }
 0x173   : > { %v1180_v2 = vunpack.i.h.bf16 %v1178_v59  ;;  %v1179_v3 = vunpack.i.l.bf16 %v1178_v59 }
 0x174   : > { %1227 = vrot.lane.b32.xlu1 %v1226_v60, %s1502_s23  ;;  %1212 = vrot.lane.b32.xlu0 %v1211_v56, %s1502_s23 }
 0x175   : > { %v395_v0 = vsel %vm394_vm14, %v1179_v3, %v1180_v2  ;;  %v396_v6 = vsel %vm394_vm14, %v1180_v2, %v393_v35  ;;  %v1236_v14 = vpack.i.bf16 %v1164_v55, %v1179_v3 }
 0x176   : > { %v1231_v8 = vpack.i.bf16 %v396_v6, %v395_v0  ;;  %v413_v9 = vpop.permute.xlu1 %412  ;;  %v1188_v10 = vpop.permute.xlu0 %1187 }
 0x177   : > { %v419_v11 = vsel %vm418_vm15, %v413_v9, %v415_v62  ;;  %v1190_v21 = vunpack.i.h.bf16 %v1188_v10  ;;  %v1189_v22 = vunpack.i.l.bf16 %v1188_v10 }
 0x178   : > { %1232 = vrot.lane.b32.xlu1 %v1231_v8, %s1502_s23  ;;  %1217 = vrot.lane.b32.xlu0 %v1216_v7, %s1502_s23 }
 0x17a   : > { %v417_v15 = vpop.permute.xlu1 %416  ;;  %v1193_v16 = vpop.permute.xlu0 %1192 }
 0x17b   : > { %v420_v17 = vsel %vm418_vm15, %v415_v62, %v417_v15  ;;  %v1195_v59 = vunpack.i.h.bf16 %v1193_v16  ;;  %v1194_v60 = vunpack.i.l.bf16 %v1193_v16 }
 0x17c   : > { %1237 = vrot.lane.b32.xlu1 %v1236_v14, %s1502_s23  ;;  %475 = vrot.lane.b32.xlu0 %v419_v11, %s1502_s23 }
 0x17d   : > { %v488_v10 = vsel %vm325_vm8, %v1194_v60, %v1195_v59 }
 0x17e   : > { %v1183_v24 = vpop.permute.xlu1 %1182  ;;  %v1198_v27 = vpop.permute.xlu0 %1197 }
 0x17f   : > { %v1185_v28 = vunpack.i.h.bf16 %v1183_v24  ;;  %v1184_v29 = vunpack.i.l.bf16 %v1183_v24  ;;  %v1200_v30 = vunpack.i.h.bf16 %v1198_v27  ;;  %v1199_v31 = vunpack.i.l.bf16 %v1198_v27 }
 0x180   : > { %477 = vrot.lane.b32.xlu1 %v420_v17, %s1502_s23  ;;  %473 = vrot.lane.b32.xlu0 %v413_v9, %s1502_s23 }
 0x181   : > { %v480_v35 = vsel %vm325_vm8, %v1199_v31, %v1200_v30  ;;  %v482_v37 = vsel %vm325_vm8, %v1184_v29, %v1185_v28  ;;  %v479_v38 = vsel %vm325_vm8, %v1189_v22, %v1199_v31  ;;  %v481_v39 = vsel %vm325_vm8, %v1190_v21, %v1184_v29 }
 0x182   : > { %v1004_v42 = vpack.c.bf16 %v482_v37, %v480_v35  ;;  %v1006_v43 = vpack.c.bf16 %v481_v39, %v479_v38 }
 0x184   : > { %634 = vrot.lane.b32.xlu1 %v602_v41, %s1504_s22  ;;  %623 = vrot.lane.b32.xlu0 %v1497_v1, %s1500_s24 }
 0x185   : > { %1005 = vmatprep.subr.bf16.mxu0 %v1004_v42 }
 0x186   : > { %1007 = vmatpush1.bf16.msra.mxu0 %v1006_v43 }
 0x188   : > { %665 = vrot.lane.b32.xlu1 %v613_v47, %s1506_s5  ;;  %645 = vrot.lane.b32.xlu0 %v605_v48, %s1505_s4 }
 0x1de   : > { %v1203_v49 = vpop.permute.xlu1 %1202 }
 0x1df   : > { %v1205_v50 = vunpack.i.h.bf16 %v1203_v49  ;;  %v1204_v19 = vunpack.i.l.bf16 %v1203_v49 }
 0x1e1   : > { %v484_v20 = vsel %vm325_vm8, %v1204_v19, %v1205_v50 }
 0x1e2   : > { %v1223_v51 = vpop.permute.xlu1 %1222  ;;  %v1208_v54 = vpop.permute.xlu0 %1207 }
 0x1e3   : > { %v1225_v55 = vunpack.i.h.bf16 %v1223_v51  ;;  %v1224_v56 = vunpack.i.l.bf16 %v1223_v51  ;;  %v1210_v57 = vunpack.i.h.bf16 %v1208_v54  ;;  %v1209_v58 = vunpack.i.l.bf16 %v1208_v54 }
 0x1e5   : > { %v486_v26 = vsel %vm325_vm8, %v1209_v58, %v1210_v57  ;;  %v483_v62 = vsel %vm325_vm8, %v1224_v56, %v1204_v19  ;;  %v485_v63 = vsel %vm325_vm8, %v1225_v55, %v1209_v58  ;;  %v421_v19 = vld [vmem:[#allocation6] sm:$0xff] }
 0x1e6   : > { %v1228_v2 = vpop.permute.xlu1 %1227  ;;  %v1213_v3 = vpop.permute.xlu0 %1212  ;;  %v1008_v5 = vpack.c.bf16 %v486_v26, %v484_v20  ;;  %v1010_v0 = vpack.c.bf16 %v485_v63, %v483_v62 }
 0x1e7   : > { %v1230_v6 = vunpack.i.h.bf16 %v1228_v2  ;;  %v1229_v7 = vunpack.i.l.bf16 %v1228_v2  ;;  %v1215_v8 = vunpack.i.h.bf16 %v1213_v3  ;;  %v1214_v9 = vunpack.i.l.bf16 %v1213_v3 }
 0x1e8   : > { %1009 = vmatprep.subr.bf16.mxu0 %v1008_v5 }
 0x1e9   : > { %1011 = vmatpush1.bf16.msra.mxu0 %v1010_v0  ;;  %v490_v11 = vsel %vm325_vm8, %v1229_v7, %v1230_v6  ;;  %v487_v14 = vsel %vm325_vm8, %v1214_v9, %v1194_v60  ;;  %v489_v15 = vsel %vm325_vm8, %v1215_v8, %v1229_v7 }
 0x1ea   : > { %v1233_v16 = vpop.permute.xlu1 %1232  ;;  %v1218_v17 = vpop.permute.xlu0 %1217  ;;  %v1012_v21 = vpack.c.bf16 %v490_v11, %v488_v10  ;;  %v1014_v22 = vpack.c.bf16 %v489_v15, %v487_v14 }
 0x1eb   : > { %v1235_v24 = vunpack.i.h.bf16 %v1233_v16  ;;  %v1234_v27 = vunpack.i.l.bf16 %v1233_v16  ;;  %v1220_v28 = vunpack.i.h.bf16 %v1218_v17  ;;  %v1219_v29 = vunpack.i.l.bf16 %v1218_v17 }
 0x1ec   : > { %1013 = vmatprep.subr.bf16.mxu0 %v1012_v21 }
 0x1ed   : > { %1015 = vmatpush1.bf16.msra.mxu0 %v1014_v22  ;;  %v492_v30 = vsel %vm325_vm8, %v1234_v27, %v1235_v24  ;;  %v494_v31 = vsel %vm325_vm8, %v1219_v29, %v1220_v28 }
 0x1ee   : > { %v1238_v35 = vpop.permute.xlu1 %1237  ;;  %v476_v37 = vpop.permute.xlu0 %475  ;;  %v1016_v38 = vpack.c.bf16 %v494_v31, %v492_v30 }
 0x1ef   : > { %v1240_v39 = vunpack.i.h.bf16 %v1238_v35  ;;  %v1239_v41 = vunpack.i.l.bf16 %v1238_v35 }
 0x1f0   : > { %1017 = vmatprep.subr.bf16.mxu0 %v1016_v38 }
 0x1f1   : > { %v491_v42 = vsel %vm325_vm8, %v1239_v41, %v1234_v27  ;;  %v493_v43 = vsel %vm325_vm8, %v1240_v39, %v1219_v29 }
 0x1f2   : > { %v478_v47 = vpop.permute.xlu1 %477  ;;  %v1018_v48 = vpack.c.bf16 %v493_v43, %v491_v42  ;;  %v474_v50 = vpop.permute.xlu0 %473 }
 0x1f3   : > { %v496_v49 = vsel %vm325_vm8, %v476_v37, %v478_v47  ;;  %v495_v51 = vsel %vm325_vm8, %v474_v50, %v476_v37 }
 0x1f4   : > { %1019 = vmatpush1.bf16.msra.mxu0 %v1018_v48 }
 0x1f5   : > { %535 = vmatprep.subr.mxu0 %v496_v49 }
 0x1f8   : > { %536 = vmatpush1.msra.mxu0 %v495_v51 }
 0x1f9   : > { %995 = vmatmul.mubr.msk.f32.vlgmr.msra.gmra.mrb[0].mxu0 %vm515_vm0, %v421_v19 }
 0x2cc   : > { %v585_v54 = vpop.f32.mrb[0].mxu0 }
 0x2cd   : > { %v590_v55 = vmax.f32 %v585_v54, 0.0  ;;  %v587_v56 = vpop.f32.mrb[1].mxu0 }
 0x2ce   : > { %v591_v57 = vmax.f32 %v587_v56, 0.0 }
 0x2cf   : > { %v606_v58 = vmul.f32 %v590_v55, %v1767_v33  ;;  %v611_v59 = vmul.f32 %v1762_v32, %v590_v55  ;;  %v603_v60 = vmul.f32 %v590_v55, %v1747_v23  ;;  %v614_v20 = vmul.f32 %v1773_v36, %v590_v55 }
 0x2d0   : > { %v1256_v26 = vpack.i.bf16 %v591_v57, %v590_v55  ;;  %v607_v62 = vmul.f32 %v1749_v25, %v591_v57  ;;  %v612_v63 = vmul.f32 %v591_v57, %v1781_v40  ;;  %v604_v2 = vmul.f32 %v1734_v18, %v591_v57 }
 0x2d1   : > { %v615_v3 = vmul.f32 %v591_v57, %v1789_v44  ;;  %v600_v32 = vmul.f32 %v590_v55, %v1833_v4  ;;  %v601_v36 = vmul.f32 %v1821_v61, %v591_v57  ;;  %v616_v18 = vmul.f32 0.0, %v1771_v34  ;;  %v635_v34 = vpop.permute.xlu1 %634  ;;  %v624_v61 = vpop.permute.xlu0 %623 }
 0x2d2   : > { %1257 = vrot.lane.b32.xlu0 %v1256_v26, %s1507_s6  ;;  %1242 = vrot.lane.b32.xlu1 %v1256_v26, %s1500_s24  ;;  %v1261_v33 = vpack.i.bf16 %v607_v62, %v606_v58  ;;  %v1266_v5 = vpack.i.bf16 %v612_v63, %v611_v59  ;;  %v1251_v23 = vpack.i.bf16 %v604_v2, %v603_v60  ;;  %v619_v40 = vmul.f32 0.0, %v1791_v45  ;;  %s875_s24 = scalar_lea.sflag [#allocation5], %s1696_s17 }
 0x2d3   : > { %v1271_v0 = vpack.i.bf16 %v615_v3, %v614_v20  ;;  %v1276_v6 = vpack.i.bf16 %v601_v36, %v600_v32  ;;  %v617_v25 = vmul.f32 %v1793_v46, %v590_v55  ;;  %v618_v44 = vmul.f32 %v591_v57, %v1810_v53 }
 0x2d5   : > { %v666_v4 = vpop.permute.xlu1 %665  ;;  %v646_v7 = vpop.permute.xlu0 %645 }
 0x2d6   : > { %1247 = vrot.lane.b32.xlu1 %v1256_v26, %s1503_s28  ;;  %1262 = vrot.lane.b32.xlu0 %v1261_v33, %s1505_s4 }
 0x2da   : > { %1267 = vrot.lane.b32.xlu0 %v1266_v5, %s1506_s5  ;;  %1252 = vrot.lane.b32.xlu1 %v1251_v23, %s1504_s22 }
 0x2de   : > { %1272 = vrot.lane.b32.xlu0 %v1271_v0, %s1508_s8  ;;  %676 = vrot.lane.b32.xlu1 %v616_v18, %s1508_s8 }
 0x2e2   : > { %694 = vrot.lane.b32.xlu0 %v617_v25, %s1509_s9  ;;  %687 = vrot.lane.b32.xlu1 %v1497_v1, %s1507_s6  ;;  %v599_v1 = vmul.f32 0.0, %v1805_v52 }
 0x2e6   : > { %698 = vrot.lane.b32.xlu0 %v619_v40, %s1509_s9  ;;  %696 = vrot.lane.b32.xlu1 %v618_v44, %s1509_s9 }
 0x2ea   : > { %1277 = vrot.lane.b32.xlu1 %v1276_v6, %s1502_s23 }
 0x344   : > { %v1258_v46 = vpop.permute.xlu0 %1257  ;;  %v1243_v8 = vpop.permute.xlu1 %1242 }
 0x345   : > { %v1245_v9 = vunpack.i.h.bf16 %v1243_v8  ;;  %v1244_v10 = vunpack.i.l.bf16 %v1243_v8  ;;  %v1260_v50 = vunpack.i.h.bf16 %v1258_v46  ;;  %v1259_v19 = vunpack.i.l.bf16 %v1258_v46 }
 0x347   : > { %v630_v45 = vsel %vm286_vm5, %v1244_v10, %v1245_v9  ;;  %v629_v53 = vsel %vm286_vm5, %v624_v61, %v1244_v10  ;;  %v689_v20 = vsel %vm406_vm13, %v1259_v19, %v1260_v50 }
 0x348   : > { %v1286_v11 = vpack.i.bf16 %v1245_v9, %v630_v45  ;;  %v1248_v14 = vpop.permute.xlu1 %1247  ;;  %v1263_v15 = vpop.permute.xlu0 %1262  ;;  %v1281_v16 = vpack.i.bf16 %v629_v53, %v599_v1 }
 0x349   : > { %v1250_v17 = vunpack.i.h.bf16 %v1248_v14  ;;  %v1249_v21 = vunpack.i.l.bf16 %v1248_v14  ;;  %v1265_v22 = vunpack.i.h.bf16 %v1263_v15  ;;  %v1264_v24 = vunpack.i.l.bf16 %v1263_v15 }
 0x34a   : > { %1287 = vrot.lane.b32.xlu0 %v1286_v11, %s1502_s23  ;;  %1282 = vrot.lane.b32.xlu1 %v1281_v16, %s1502_s23 }
 0x34b   : > { %v657_v27 = vsel %vm260_vm9, %v1249_v21, %v1250_v17  ;;  %v652_v30 = vsel %vm365_vm11, %v1264_v24, %v1265_v22  ;;  %v651_v38 = vsel %vm365_vm11, %v646_v7, %v1264_v24 }
 0x34c   : > { %v1291_v28 = vpack.i.bf16 %v1250_v17, %v657_v27  ;;  %v1268_v52 = vpop.permute.xlu0 %1267  ;;  %v1253_v29 = vpop.permute.xlu1 %1252  ;;  %v1306_v39 = vpack.i.bf16 %v1265_v22, %v652_v30 }
 0x34d   : > { %v1255_v31 = vunpack.i.h.bf16 %v1253_v29  ;;  %v1254_v35 = vunpack.i.l.bf16 %v1253_v29  ;;  %v1270_v41 = vunpack.i.h.bf16 %v1268_v52  ;;  %v1269_v42 = vunpack.i.l.bf16 %v1268_v52 }
 0x34e   : > { %1292 = vrot.lane.b32.xlu1 %v1291_v28, %s1502_s23 }
 0x34f   : > { %v640_v37 = vsel %vm353_vm10, %v635_v34, %v1254_v35  ;;  %v641_v48 = vsel %vm353_vm10, %v1254_v35, %v1255_v31  ;;  %v1311_v51 = vpack.i.bf16 %v1269_v42, %v1249_v21  ;;  %v667_v56 = vsel %vm382_vm12, %v1269_v42, %v1270_v41 }
 0x350   : > { %v677_v43 = vpop.permute.xlu1 %676  ;;  %v1296_v47 = vpack.i.bf16 %v651_v38, %v640_v37  ;;  %v1273_v49 = vpop.permute.xlu0 %1272  ;;  %v1301_v54 = vpack.i.bf16 %v1255_v31, %v641_v48  ;;  %v668_v60 = vsel %vm382_vm12, %v1270_v41, %v666_v4 }
 0x351   : > { %v1275_v57 = vunpack.i.h.bf16 %v1273_v49  ;;  %v1274_v58 = vunpack.i.l.bf16 %v1273_v49  ;;  %v1321_v62 = vpack.i.bf16 %v668_v60, %v667_v56 }
 0x352   : > { %1297 = vrot.lane.b32.xlu0 %v1296_v47, %s1502_s23  ;;  %1307 = vrot.lane.b32.xlu1 %v1306_v39, %s1502_s23 }
 0x353   : > { %v678_v63 = vsel %vm394_vm14, %v1274_v58, %v1275_v57  ;;  %v679_v2 = vsel %vm394_vm14, %v1275_v57, %v677_v43  ;;  %v1331_v23 = vpack.i.bf16 %v1259_v19, %v1274_v58 }
 0x354   : > { %v688_v55 = vpop.permute.xlu1 %687  ;;  %v1326_v33 = vpack.i.bf16 %v679_v2, %v678_v63  ;;  %v695_v32 = vpop.permute.xlu0 %694 }
 0x355   : > { %v690_v59 = vsel %vm406_vm13, %v1260_v50, %v688_v55 }
 0x356   : > { %1302 = vrot.lane.b32.xlu0 %v1301_v54, %s1502_s23  ;;  %1312 = vrot.lane.b32.xlu1 %v1311_v51, %s1502_s23  ;;  %v1316_v26 = vpack.i.bf16 %v690_v59, %v689_v20 }
 0x358   : > { %v697_v3 = vpop.permute.xlu1 %696  ;;  %v699_v0 = vpop.permute.xlu0 %698 }
 0x359   : > { %v700_v5 = vsel %vm418_vm15, %v695_v32, %v697_v3  ;;  %v701_v36 = vsel %vm418_vm15, %v697_v3, %v699_v0 }
 0x35a   : > { %1322 = vrot.lane.b32.xlu0 %v1321_v62, %s1502_s23  ;;  %1317 = vrot.lane.b32.xlu1 %v1316_v26, %s1502_s23 }
 0x35c   : > { %v1278_v6 = vpop.permute.xlu1 %1277 }
 0x35d   : > { %v1280_v18 = vunpack.i.h.bf16 %v1278_v6  ;;  %v1279_v25 = vunpack.i.l.bf16 %v1278_v6 }
 0x35e   : > { %1327 = vrot.lane.b32.xlu0 %v1326_v33, %s1502_s23  ;;  %756 = vrot.lane.b32.xlu1 %v700_v5, %s1502_s23 }
 0x35f   : > { %v761_v46 = vsel %vm325_vm8, %v1279_v25, %v1280_v18 }
 0x362   : > { %1332 = vrot.lane.b32.xlu0 %v1331_v23, %s1502_s23  ;;  %754 = vrot.lane.b32.xlu1 %v695_v32, %s1502_s23 }
 0x366   : > { %758 = vrot.lane.b32.xlu0 %v701_v36, %s1502_s23  ;;  %s1426_s23 = sshll.u32 %s1510_s21, 4  ;;  %s1427_s23 = int_to_ptr.vmem [resolvable:$false] %s1426_s23 }
 0x367   : > { %s1428_s28 = scalar_lea.vmem %s1427_s23, 512  ;;  %p1429_p8 = scmp.lt.s32.totalorder %s1985_s29, %s1427_s23 }
 0x368   : > { %p1430_p12 = scmp.lt.s32.totalorder %s1428_s28, %s1422_s16 }
 0x36a   : > { %p1431_p3 = por %p1430_p12, %p1429_p8 }
 0x36c   : > { %p1432_p7 = pnand %p1431_p3, %p1425_p4 }
 0x3bc   : > { %v1288_v40 = vpop.permute.xlu0 %1287  ;;  %v1283_v44 = vpop.permute.xlu1 %1282 }
 0x3bd   : > { %v1290_v34 = vunpack.i.h.bf16 %v1288_v40  ;;  %v1289_v61 = vunpack.i.l.bf16 %v1288_v40  ;;  %v1285_v4 = vunpack.i.h.bf16 %v1283_v44  ;;  %v1284_v7 = vunpack.i.l.bf16 %v1283_v44 }
 0x3bf   : > { %v763_v8 = vsel %vm325_vm8, %v1289_v61, %v1290_v34  ;;  %v760_v9 = vsel %vm325_vm8, %v1284_v7, %v1279_v25  ;;  %v762_v10 = vsel %vm325_vm8, %v1285_v4, %v1289_v61  ;;  %v702_v25 = vld [vmem:[#allocation8] sm:$0xff] }
 0x3c0   : > { %v1293_v1 = vpop.permute.xlu1 %1292  ;;  %v1020_v45 = vpack.c.bf16 %v763_v8, %v761_v46  ;;  %v1022_v53 = vpack.c.bf16 %v762_v10, %v760_v9 }
 0x3c1   : > { %v1295_v52 = vunpack.i.h.bf16 %v1293_v1  ;;  %v1294_v29 = vunpack.i.l.bf16 %v1293_v1 }
 0x3c2   : > { %1021 = vmatprep.subr.bf16.mxu1 %v1020_v45 }
 0x3c3   : > { %1023 = vmatpush1.bf16.msra.mxu1 %v1022_v53  ;;  %v769_v50 = vsel %vm325_vm8, %v1294_v29, %v1295_v52 }
 0x3c4   : > { %v1298_v11 = vpop.permute.xlu0 %1297  ;;  %v1308_v14 = vpop.permute.xlu1 %1307 }
 0x3c5   : > { %v1300_v15 = vunpack.i.h.bf16 %v1298_v11  ;;  %v1310_v16 = vunpack.i.h.bf16 %v1308_v14  ;;  %v1309_v17 = vunpack.i.l.bf16 %v1308_v14  ;;  %v1299_v24 = vunpack.i.l.bf16 %v1298_v11 }
 0x3c7   : > { %v767_v35 = vsel %vm325_vm8, %v1309_v17, %v1310_v16  ;;  %v766_v38 = vsel %vm325_vm8, %v1300_v15, %v1309_v17 }
 0x3c8   : > { %v1303_v21 = vpop.permute.xlu0 %1302  ;;  %v1313_v22 = vpop.permute.xlu1 %1312 }
 0x3c9   : > { %v1305_v27 = vunpack.i.h.bf16 %v1303_v21  ;;  %v1304_v28 = vunpack.i.l.bf16 %v1303_v21  ;;  %v1314_v30 = vunpack.i.l.bf16 %v1313_v22  ;;  %v1315_v47 = vunpack.i.h.bf16 %v1313_v22 }
 0x3cb   : > { %v765_v31 = vsel %vm325_vm8, %v1304_v28, %v1305_v27  ;;  %v764_v37 = vsel %vm325_vm8, %v1299_v24, %v1304_v28  ;;  %v768_v19 = vsel %vm325_vm8, %v1314_v30, %v1294_v29 }
 0x3cc   : > { %v1323_v39 = vpop.permute.xlu0 %1322  ;;  %v1318_v41 = vpop.permute.xlu1 %1317  ;;  %v1024_v42 = vpack.c.bf16 %v767_v35, %v765_v31  ;;  %v1026_v43 = vpack.c.bf16 %v766_v38, %v764_v37 }
 0x3cd   : > { %v1325_v48 = vunpack.i.h.bf16 %v1323_v39  ;;  %v1324_v49 = vunpack.i.l.bf16 %v1323_v39  ;;  %v1320_v51 = vunpack.i.h.bf16 %v1318_v41  ;;  %v1319_v54 = vunpack.i.l.bf16 %v1318_v41 }
 0x3ce   : > { %1025 = vmatprep.subr.bf16.mxu1 %v1024_v42 }
 0x3cf   : > { %1027 = vmatpush1.bf16.msra.mxu1 %v1026_v43  ;;  %v771_v55 = vsel %vm325_vm8, %v1324_v49, %v1325_v48  ;;  %v770_v56 = vsel %vm325_vm8, %v1315_v47, %v1324_v49  ;;  %v775_v62 = vsel %vm325_vm8, %v1319_v54, %v1320_v51 }
 0x3d0   : > { %v1328_v57 = vpop.permute.xlu0 %1327  ;;  %v1028_v58 = vpack.c.bf16 %v771_v55, %v769_v50  ;;  %v1030_v59 = vpack.c.bf16 %v770_v56, %v768_v19  ;;  %v757_v63 = vpop.permute.xlu1 %756 }
 0x3d1   : > { %v1330_v60 = vunpack.i.h.bf16 %v1328_v57  ;;  %v1329_v20 = vunpack.i.l.bf16 %v1328_v57 }
 0x3d2   : > { %1029 = vmatprep.subr.bf16.mxu1 %v1028_v58 }
 0x3d3   : > { %1031 = vmatpush1.bf16.msra.mxu1 %v1030_v59  ;;  %v773_v26 = vsel %vm325_vm8, %v1329_v20, %v1330_v60 }
 0x3d4   : > { %v1333_v2 = vpop.permute.xlu0 %1332  ;;  %v1032_v3 = vpack.c.bf16 %v775_v62, %v773_v26  ;;  %v755_v18 = vpop.permute.xlu1 %754 }
 0x3d5   : > { %v1335_v33 = vunpack.i.h.bf16 %v1333_v2  ;;  %v1334_v32 = vunpack.i.l.bf16 %v1333_v2  ;;  %v776_v40 = vsel %vm325_vm8, %v755_v18, %v757_v63 }
 0x3d6   : > { %1033 = vmatprep.subr.bf16.mxu1 %v1032_v3 }
 0x3d7   : > { %v772_v5 = vsel %vm325_vm8, %v1334_v32, %v1329_v20  ;;  %v774_v23 = vsel %vm325_vm8, %v1335_v33, %v1319_v54 }
 0x3d8   : > { %v759_v0 = vpop.permute.xlu0 %758  ;;  %v1034_v36 = vpack.c.bf16 %v774_v23, %v772_v5 }
 0x3d9   : > { %v777_v6 = vsel %vm325_vm8, %v757_v63, %v759_v0 }
 0x3da   : > { %1035 = vmatpush1.bf16.msra.mxu1 %v1034_v36 }
 0x3db   : > { %815 = vmatprep.subr.mxu1 %v777_v6 }
 0x3de   : > { %816 = vmatpush1.msra.mxu1 %v776_v40 }
 0x3df   : > { %996 = vmatmul.mubr.msk.f32.vlgmr.msra.gmra.mrb[0].mxu1 %vm515_vm0, %v702_v25 }
 0x4b2   : > { %v865_v44 = vpop.f32.mrb[0].mxu1 }
 0x4b3   : > { %v866_v34 = vadd.f32 %v865_v44, %v1718_v12  ;;  %v867_v61 = vpop.f32.mrb[1].mxu1 }
 0x4b4   : > { %v868_v4 = vadd.f32 %v867_v61, %v1721_v13 }
 0x4b5   : > { %v870_v7 = vmax.f32 %v866_v34, 0.0 }
 0x4b6   : > { %v871_v46 = vmax.f32 %v868_v4, 0.0 }
 0x4b7   : > { %872 = vst [vmem:[%s211_s27] sm:$0xff] %v870_v7 }
 0x4b8   : > { %873 = vst [vmem:[%s211_s27 + $0x8] sm:$0xff] %v871_v46 }
 0x4b9   : > { %1435 = shalt.err (!%p1432_p7)
}
 0x4ba   : > { %s1436_s17 = scalar_lea.hbm %s1983_s20, 256  ;;  %s1440_s5 = scalar_lea.hbm %s2030_s3, 512 }
 0x4bb   : > { %p1437_p10 = scmp.ne.s32.totalorder %s1983_s20, %s1436_s17  ;;  %p1441_p0 = scmp.lt.u32.totalorder %s1983_s20, %s2030_s3 }
 0x4bc   : > { %p1442_p11 = scmp.lt.u32.totalorder %s1440_s5, %s1436_s17  ;;  %p1444_p2 = scmp.lt.u32.totalorder %s1436_s17, %s1983_s20 }
 0x4bd   : > { %p1438_p13 = pnand %p1437_p10, %p1650_p6 }
 0x4be   : > { %p1443_p9 = por %p1442_p11, %p1441_p0 }
 0x4bf   : > { %p1439_p5 = pneg %p1438_p13 }
 0x4c0   : > { %p1445_p1 = por %p1444_p2, %p1443_p9 }
 0x4c2   : > { %p1446_p4 = pnand %p1445_p1, %p1439_p5 }
 0x4c4   : > { %1449 = shalt.err (!%p1446_p4)
}
 0x4c5   : > { %1046 = dma.vmem_to_hbm [thread:$0]  (%p1650_p6), %s1985_s29, 256, %s1983_s20, %s875_s24  }
 0x4c6 PF: > { %s901_s9 = sand.u32 1, %s1480_s12   ;;  %p2045_p8 = scmp.ne.s32.totalorder %s2035_s19, 0 }
 0x4c7   : > { %p2046_p12 = scmp.ge.s32.totalorder %s1492_s15, 2  ;;  %s902_s10 = scalar_lea.sflag [#allocation5], %s901_s9 }
 0x4c9   : > { %p1060_p3 = pnand %p2046_p12, %p2045_p8 }
 0x4cb   : > { %1475 = dma.done.wait (!%p1060_p3), %s902_s10, 256  }
 0x4cc   : > { %1477 = vsyncadd (!%p1060_p3), %s902_s10, 4294967040  ;;  %p17_p7 = scmp.ge.s32.totalorder %s1587_s26, 4   ;;  %s2047_s12 = smov %s1484_s13 }
 0x4cd   : > { %s2048_s13 = smov %s1488_s14  ;;  %s2049_s14 = smov %s1646_s25 }
 0x4ce   : > { %s2050_s15 = smov %s1587_s26  ;;  %19 = sbr.rel (!%p17_p7) target bundleno = 6 (0x6), region = 85 }
 0x4d5   :  { %907 = vsyncpa [#allocation4], 1 }
 0x4d6   :  { %909 = vsyncpa [#allocation4 + $0x1], 1 }
 0x4d7   :  { %910 = vsyncpa [#allocation7], 1 }
 0x4d8   :  { %911 = vsyncpa [#allocation5], 1 }
 0x4d9   :  { %913 = vsyncpa [#allocation5 + $0x1], 1 }

</bundles_post_ra>
